<compile_context>
chip_gen: v6e
topology: v6e:2x2x1
jax: 0.10.0
libtpu: 0.0.40
codegen_flags: <defaults>
</compile_context>

<pallas_src>
import functools
import math

import numpy as np

import jax
import jax.numpy as jnp
from jax.experimental import pallas as pl
from jax.experimental.pallas import tpu as pltpu

_LANES = 128
_TARGET_BLOCK_BYTES = 8 * 1024 * 1024   # ~8 MiB blocks; 2x double-buffered in+out ~= 32 MiB
_VMEM_LIMIT = 48 * 1024 * 1024          # fits v7x's 64 MiB physical VMEM with headroom


def _row_tile(n_rows, row_bytes, min_steps=4):
    """Row-block size: multiple of 16 (dtype-packing friendly), >= min_steps grid steps
    when the array is big enough, ~_TARGET_BLOCK_BYTES per block."""
    cap = max(16, (_TARGET_BLOCK_BYTES // max(1, row_bytes)) // 16 * 16)
    if n_rows <= 16:
        return max(1, n_rows)                    # single block == full extent (legal)
    tile = min(cap, (n_rows + min_steps - 1) // min_steps)
    tile = ((tile + 15) // 16) * 16
    tile = min(tile, cap)
    if tile >= n_rows:
        return n_rows                            # single full-extent block
    return tile


# --------------------------------------------------------------------------------------
# Kernels
# --------------------------------------------------------------------------------------

def _butterfly_group_reverse_kernel(x_ref, o_ref, *, width):
    """out[:, l] = x[:, l XOR (width-1)] for lane-aligned groups of `width` (pow2) lanes.

    log2(width)-stage butterfly of lane rotations (XLU) + selects (VPU).  No MXU, no
    gathers; any dtype; rows are independent so clipped edge blocks are safe.
    """
    x = x_ref[...]
    lanes = x_ref.shape[-1]                                     # 128
    lane = jax.lax.broadcasted_iota(jnp.int32, (1, lanes), 1)
    d = 1
    while d < width:
        fwd = pltpu.roll(x, shift=d, axis=1)
        if 2 * d == lanes:
            # Rotation by half the lane count: +d and -d coincide -> one roll, no select.
            x = fwd
        else:
            bwd = pltpu.roll(x, shift=lanes - d, axis=1)
            # Select mask built by applying the same rotation to the (1,128) lane iota:
            # a single extra vreg of work per stage (vs. tile/8 vregs per data roll) and
            # independent of roll's sign convention / cyclic wrap-around.
            fwd_src = pltpu.roll(lane, shift=d, axis=1)
            x = jnp.where(fwd_src == (lane ^ d), fwd, bwd)
        d *= 2
    o_ref[...] = x


def _mxu_group_reverse_kernel(x_ref, p_ref, o_ref):
    """Reverse-within-groups via one matmul against a resident permutation matrix."""
    o_ref[...] = jnp.dot(x_ref[...], p_ref[...],
                         preferred_element_type=jnp.float32).astype(o_ref.dtype)


def _rev_minor_kernel(x_ref, o_ref):
    # Generic fallback (W neither pow2<=128 nor a multiple of 128): reverse the lane axis.
    o_ref[...] = jax.lax.rev(x_ref[...], dimensions=(1,))


def _copy_kernel(x_ref, o_ref):
    o_ref[...] = x_ref[...]


# --------------------------------------------------------------------------------------
# pallas_call builders
# --------------------------------------------------------------------------------------

def _reverse_perm_matrix(width, dtype):
    idx = np.arange(_LANES)
    perm = idx ^ (width - 1)
    p = np.zeros((_LANES, _LANES), dtype=np.float32)
    p[perm, idx] = 1.0
    return jnp.asarray(p, dtype=dtype)


def _reverse_groups_call(x2, *, width, tile, grid, x_in_map, x_out_map, use_mxu):
    """Reverse every lane-aligned group of `width` lanes inside (tile,128) blocks of x2."""
    block = (tile, _LANES)
    if use_mxu:
        kernel = _mxu_group_reverse_kernel
        perm = _reverse_perm_matrix(width, x2.dtype)
        in_specs = [pl.BlockSpec(block, x_in_map),
                    pl.BlockSpec((_LANES, _LANES), lambda *_: (0, 0))]   # resident in VMEM
        operands = (x2, perm)
    else:
        kernel = functools.partial(_butterfly_group_reverse_kernel, width=width)
        in_specs = [pl.BlockSpec(block, x_in_map)]
        operands = (x2,)
    return pl.pallas_call(
        kernel,
        out_shape=jax.ShapeDtypeStruct(x2.shape, x2.dtype),
        grid_spec=pltpu.PrefetchScalarGridSpec(
            num_scalar_prefetch=0,
            grid=grid,
            in_specs=in_specs,
            out_specs=pl.BlockSpec(block, x_out_map),
        ),
        compiler_params=pltpu.CompilerParams(
            dimension_semantics=("parallel",) * len(grid),
            vmem_limit_bytes=_VMEM_LIMIT,
        ),
    )(*operands)


def _flip_last_axis(x, use_mxu):
    shape = x.shape
    width = shape[-1]
    rows = max(1, math.prod(shape[:-1]))
    itemsize = jnp.dtype(x.dtype).itemsize
    # MXU permutation path: bf16 only (native single-pass MXU dtype; multiply-by-one in the
    # f32 accumulator is bit-exact for finite values).  Everything else uses the butterfly.
    use_mxu = bool(use_mxu) and x.dtype == jnp.bfloat16

    if (width & (width - 1)) == 0 and width <= _LANES:
        # Lane-dense packed path: 128 // width rows per 128-wide slab row (free reshape).
        group = _LANES // width
        pad_rows = (-rows) % group
        x2 = x.reshape(rows, width)
        if pad_rows:
            # < group (<= 127) dummy rows keep the whole tensor lane-dense instead of
            # demoting it to width/128-utilized masked stores.
            x2 = jnp.pad(x2, ((0, pad_rows), (0, 0)))
        packed_rows = (rows + pad_rows) // group
        x2 = x2.reshape(packed_rows, _LANES)
        tile = _row_tile(packed_rows, _LANES * itemsize)
        out2 = _reverse_groups_call(
            x2, width=width, tile=tile, grid=(pl.cdiv(packed_rows, tile),),
            x_in_map=lambda i: (i, 0), x_out_map=lambda i: (i, 0),
            use_mxu=use_mxu)
        out2 = out2.reshape(packed_rows * group, width)
        if pad_rows:
            out2 = out2[:rows]
        return out2.reshape(shape)

    if width % _LANES == 0:
        # W multiple of 128 (incl. pow2 > 128): chunk-order reversal is pure output
        # index_map addressing; only the intra-chunk reverse is done in-register.
        chunks = width // _LANES
        x2 = x.reshape(rows, width)
        tile = _row_tile(rows, _LANES * itemsize, min_steps=max(1, 4 // chunks))
        grid = (pl.cdiv(rows, tile), chunks)
        out2 = _reverse_groups_call(
            x2, width=_LANES, tile=tile, grid=grid,
            x_in_map=lambda i, j: (i, j),
            x_out_map=lambda i, j: (i, chunks - 1 - j),
            use_mxu=use_mxu)
        return out2.reshape(shape)

    # Generic fallback: W neither a power of two <= 128 nor a multiple of 128.
    if 16 * width * itemsize > _TARGET_BLOCK_BYTES:
        # TODO(synk): chunked kernel for huge widths that are not multiples of 128.
        return jnp.flip(x, axis=-1)
    x2 = x.reshape(rows, width)
    tile = _row_tile(rows, width * itemsize)
    out2 = pl.pallas_call(
        _rev_minor_kernel,
        out_shape=jax.ShapeDtypeStruct((rows, width), x.dtype),
        grid_spec=pltpu.PrefetchScalarGridSpec(
            num_scalar_prefetch=0,
            grid=(pl.cdiv(rows, tile),),
            in_specs=[pl.BlockSpec((tile, width), lambda i: (i, 0))],
            out_specs=pl.BlockSpec((tile, width), lambda i: (i, 0)),
        ),
        compiler_params=pltpu.CompilerParams(
            dimension_semantics=("parallel",),
            vmem_limit_bytes=_VMEM_LIMIT,
        ),
    )(x2)
    return out2.reshape(shape)


def _flip_middle_axis(x, axis):
    """Flip along a non-minor axis: pure-copy kernel, flip done by the output index_map."""
    shape = x.shape
    F = shape[axis]
    outer = max(1, math.prod(shape[:axis]))
    inner = max(1, math.prod(shape[axis + 1:]))
    itemsize = jnp.dtype(x.dtype).itemsize

    if inner % _LANES == 0:
        # Fully dense layout: lanes AND sublanes of every block/DMA are fully used.
        inner_hi, lane_dim = inner // _LANES, _LANES
        max_hi = max(1, _TARGET_BLOCK_BYTES // (16 * _LANES * itemsize))
        if inner_hi <= max_hi:
            c_hi, n_c = inner_hi, 1
        else:
            c_hi = max(8, (max_hi // 8) * 8)
            n_c = pl.cdiv(inner_hi, c_hi)
    else:
        # TODO(synk): inner not a multiple of 128 (esp. inner < 128) stays on this
        # narrow-lane layout; a lane-dense repack (reverse-of-inner-groups inside 128-lane
        # rows) would be multi-x faster but needs an in-kernel sublane reverse.
        if 16 * inner * itemsize > _TARGET_BLOCK_BYTES:
            return jnp.flip(x, axis=axis)        # pathological width; keep VMEM bounded
        inner_hi, lane_dim = 1, inner
        c_hi, n_c = 1, 1

    x4 = x.reshape(outer, F, inner_hi, lane_dim)
    tile = _row_tile(outer, c_hi * lane_dim * itemsize,
                     min_steps=max(1, 4 // (F * n_c)))
    grid = (pl.cdiv(outer, tile), F, n_c)
    block = (tile, 1, c_hi, lane_dim)

    out4 = pl.pallas_call(
        _copy_kernel,
        out_shape=jax.ShapeDtypeStruct(x4.shape, x.dtype),
        grid_spec=pltpu.PrefetchScalarGridSpec(
            num_scalar_prefetch=0,
            grid=grid,
            in_specs=[pl.BlockSpec(block, lambda o, f, c: (o, f, c, 0))],
            out_specs=pl.BlockSpec(block, lambda o, f, c: (o, F - 1 - f, c, 0)),
        ),
        compiler_params=pltpu.CompilerParams(
            dimension_semantics=("parallel", "parallel", "parallel"),
            vmem_limit_bytes=_VMEM_LIMIT,
        ),
    )(x4)
    return out4.reshape(shape)


def flip_lr(x, dim_w=3, use_mxu_permute=False):
    """Equivalent of FlipLR(imW=x.shape[dim_w], dim_w).forward(x)."""
    axis = dim_w % x.ndim
    if x.size == 0 or x.shape[axis] <= 1:
        return x
    if axis == x.ndim - 1:
        return _flip_last_axis(x, use_mxu_permute)
    return _flip_middle_axis(x, axis)


class FlipLR:
    """Pallas equivalent of the PyTorch FlipLR module."""

    def __init__(self, imW, dim_w, use_mxu_permute=False):
        self.imW = imW
        self.dim_w = dim_w
        self.use_mxu_permute = use_mxu_permute

    def __call__(self, x):
        return flip_lr(x, self.dim_w, use_mxu_permute=self.use_mxu_permute)


if __name__ == "__main__":
    key = jax.random.PRNGKey(0)
    k1, k2, k3, k4 = jax.random.split(key, 4)

    # 1) Canonical NCHW use: FlipLR(imW=16, dim_w=3) -> packed lane-dense butterfly path.
    x = jax.random.normal(k1, (2, 4, 16, 16), dtype=jnp.float32)
    out = jax.block_until_ready(FlipLR(16, 3)(x))
    assert out.shape == x.shape and out.dtype == x.dtype
    assert jnp.array_equal(out, jnp.flip(x, axis=3))

    # 2) rows not a multiple of 128/W -> pad-to-lane-dense path.
    x2 = jax.random.normal(k2, (1, 3, 5, 16), dtype=jnp.float32)
    out2 = jax.block_until_ready(flip_lr(x2, 3))
    assert jnp.array_equal(out2, jnp.flip(x2, axis=3))

    # 3) W a multiple of 128 -> chunked path (chunk reversal via the output index_map).
    x3 = jax.random.normal(k3, (2, 2, 4, 256), dtype=jnp.float32)
    out3 = jax.block_until_ready(flip_lr(x3, 3))
    assert jnp.array_equal(out3, jnp.flip(x3, axis=3))

    # 4) Flip a non-minor axis (dim_w=2) with inner % 128 == 0 -> dense copy path.
    x4 = jax.random.normal(k4, (2, 3, 8, 256), dtype=jnp.float32)
    out4 = jax.block_until_ready(flip_lr(x4, 2))
    assert jnp.array_equal(out4, jnp.flip(x4, axis=2))

    # 5) Optional MXU permutation path (bf16, finite data -> bit-exact).
    xb = x.astype(jnp.bfloat16)
    outb = jax.block_until_ready(flip_lr(xb, 3, use_mxu_permute=True))
    assert outb.dtype == jnp.bfloat16
    assert jnp.array_equal(outb, jnp.flip(xb, axis=3))

    print("KERNEL_OK")
</pallas_src>

<mosaic_0001>
module attributes {stable_mosaic.version = 11 : i64} {
  func.func @_butterfly_group_reverse_kernel(%arg0: i32, %arg1: memref<16x128xf32, #tpu.memory_space<vmem>>, %arg2: memref<16x128xf32, #tpu.memory_space<vmem>>) attributes {dimension_semantics = [#tpu.dimension_semantics<parallel>], iteration_bounds = array<i64: 1>, scalar_prefetch = 0 : i64, scratch_operands = 0 : i64, tpu.core_type = #tpu.core_type<tc>, window_params = [{transform_indices = @transform_0, window_bounds = array<i64: 16, 128>}, {transform_indices = @transform_1, window_bounds = array<i64: 16, 128>}]} {
    %c0 = arith.constant 0 : index
    %c0_0 = arith.constant 0 : index
    %0 = vector.load %arg1[%c0, %c0_0] : memref<16x128xf32, #tpu.memory_space<vmem>>, vector<16x128xf32>
    %1 = tpu.iota {dimensions = array<i32: 1>} : vector<1x128xi32>
    %c1_i32 = arith.constant 1 : i32
    %2 = tpu.dynamic_rotate %0 by %c1_i32 dim 1 : vector<16x128xf32>, i32 -> vector<16x128xf32>
    %c127_i32 = arith.constant 127 : i32
    %3 = tpu.dynamic_rotate %0 by %c127_i32 dim 1 : vector<16x128xf32>, i32 -> vector<16x128xf32>
    %c1_i32_1 = arith.constant 1 : i32
    %4 = tpu.dynamic_rotate %1 by %c1_i32_1 dim 1 : vector<1x128xi32>, i32 -> vector<1x128xi32>
    %c1_i32_2 = arith.constant 1 : i32
    %5 = vector.broadcast %c1_i32_2 : i32 to vector<1x128xi32>
    %6 = arith.xori %1, %5 : vector<1x128xi32>
    %7 = arith.cmpi eq, %4, %6 : vector<1x128xi32>
    %8 = vector.shape_cast %7 : vector<1x128xi1> to vector<1x128xi1>
    %9 = vector.broadcast %8 : vector<1x128xi1> to vector<16x128xi1>
    %10 = arith.select %9, %2, %3 : vector<16x128xi1>, vector<16x128xf32>
    %c2_i32 = arith.constant 2 : i32
    %11 = tpu.dynamic_rotate %10 by %c2_i32 dim 1 : vector<16x128xf32>, i32 -> vector<16x128xf32>
    %c126_i32 = arith.constant 126 : i32
    %12 = tpu.dynamic_rotate %10 by %c126_i32 dim 1 : vector<16x128xf32>, i32 -> vector<16x128xf32>
    %c2_i32_3 = arith.constant 2 : i32
    %13 = tpu.dynamic_rotate %1 by %c2_i32_3 dim 1 : vector<1x128xi32>, i32 -> vector<1x128xi32>
    %c2_i32_4 = arith.constant 2 : i32
    %14 = vector.broadcast %c2_i32_4 : i32 to vector<1x128xi32>
    %15 = arith.xori %1, %14 : vector<1x128xi32>
    %16 = arith.cmpi eq, %13, %15 : vector<1x128xi32>
    %17 = vector.shape_cast %16 : vector<1x128xi1> to vector<1x128xi1>
    %18 = vector.broadcast %17 : vector<1x128xi1> to vector<16x128xi1>
    %19 = arith.select %18, %11, %12 : vector<16x128xi1>, vector<16x128xf32>
    %c4_i32 = arith.constant 4 : i32
    %20 = tpu.dynamic_rotate %19 by %c4_i32 dim 1 : vector<16x128xf32>, i32 -> vector<16x128xf32>
    %c124_i32 = arith.constant 124 : i32
    %21 = tpu.dynamic_rotate %19 by %c124_i32 dim 1 : vector<16x128xf32>, i32 -> vector<16x128xf32>
    %c4_i32_5 = arith.constant 4 : i32
    %22 = tpu.dynamic_rotate %1 by %c4_i32_5 dim 1 : vector<1x128xi32>, i32 -> vector<1x128xi32>
    %c4_i32_6 = arith.constant 4 : i32
    %23 = vector.broadcast %c4_i32_6 : i32 to vector<1x128xi32>
    %24 = arith.xori %1, %23 : vector<1x128xi32>
    %25 = arith.cmpi eq, %22, %24 : vector<1x128xi32>
    %26 = vector.shape_cast %25 : vector<1x128xi1> to vector<1x128xi1>
    %27 = vector.broadcast %26 : vector<1x128xi1> to vector<16x128xi1>
    %28 = arith.select %27, %20, %21 : vector<16x128xi1>, vector<16x128xf32>
    %c8_i32 = arith.constant 8 : i32
    %29 = tpu.dynamic_rotate %28 by %c8_i32 dim 1 : vector<16x128xf32>, i32 -> vector<16x128xf32>
    %c120_i32 = arith.constant 120 : i32
    %30 = tpu.dynamic_rotate %28 by %c120_i32 dim 1 : vector<16x128xf32>, i32 -> vector<16x128xf32>
    %c8_i32_7 = arith.constant 8 : i32
    %31 = tpu.dynamic_rotate %1 by %c8_i32_7 dim 1 : vector<1x128xi32>, i32 -> vector<1x128xi32>
    %c8_i32_8 = arith.constant 8 : i32
    %32 = vector.broadcast %c8_i32_8 : i32 to vector<1x128xi32>
    %33 = arith.xori %1, %32 : vector<1x128xi32>
    %34 = arith.cmpi eq, %31, %33 : vector<1x128xi32>
    %35 = vector.shape_cast %34 : vector<1x128xi1> to vector<1x128xi1>
    %36 = vector.broadcast %35 : vector<1x128xi1> to vector<16x128xi1>
    %37 = arith.select %36, %29, %30 : vector<16x128xi1>, vector<16x128xf32>
    %c0_9 = arith.constant 0 : index
    %c0_10 = arith.constant 0 : index
    %38 = vector.load %arg2[%c0_9, %c0_10] : memref<16x128xf32, #tpu.memory_space<vmem>>, vector<16x128xf32>
    tpu.vector_store %arg2[%c0_9, %c0_10], %37 {strides = array<i32>} : memref<16x128xf32, #tpu.memory_space<vmem>>, vector<16x128xf32>,
    return
  }
  func.func @transform_0(%arg0: i32) -> (i32, i32) {
    %c0_i32 = arith.constant 0 : i32
    %c0_i32_0 = arith.constant 0 : i32
    return %arg0, %c0_i32 : i32, i32
  }
  func.func @transform_1(%arg0: i32) -> (i32, i32) {
    %c0_i32 = arith.constant 0 : i32
    %c0_i32_0 = arith.constant 0 : i32
    return %arg0, %c0_i32 : i32, i32
  }
}

</mosaic_0001>

<bundles_post_ra>
// kernel: tpu_custom_call.1
= control target key start
LH: loop header
LB: loop body
LE: loop exit
PB: predicated region body
PF: predicated region fallthrough
CT: control target
= control target key end

     0   :  { %6 = vsyncpa [#allocation3], 0  ;;  %s235_s0 = inlined_call_operand.hbm [shape: f32[16,128], index: 0, kind: input, shape index: {}]   ;;  %s236_s1 = inlined_call_operand.hbm [shape: f32[16,128], index: 1, kind: output, shape index: {}]  }
   0x1   :  { %7 = vsyncpa [#allocation4], 0  ;;  %s182_s6 = smov [#allocation2]  }
   0x2   :  { %s13_s7 = sshll.u32 %s182_s6, 4  ;;  %s14_s7 = int_to_ptr.vmem [resolvable:$true] %s13_s7 }
   0x3   :  { %s146_s8 = scalar_lea.vmem %s14_s7, 256  ;;  %p151_p1 = scmp.lt.s32.totalorder %s14_s7, %s14_s7 }
   0x4   :  { %p147_p0 = scmp.ne.s32.totalorder %s14_s7, %s146_s8  ;;  %p152_p2 = scmp.lt.s32.totalorder %s146_s8, %s146_s8 }
   0x6   :  { %p153_p3 = por %p152_p2, %p151_p1 }
   0x8   :  { %p154_p4 = pnand %p153_p3, %p147_p0 }
   0xa   :  { %157 = shalt.err (!%p154_p4)
}
   0xb   :  { %s183_s9 = smov 128   ;;  %s184_s10 = smov 8  }
   0xc   :  { %19 = dma.hbm_to_vmem [thread:$0]  %s235_s0, 256, %s14_s7, [#allocation3], %s183_s9, %s183_s9, %s184_s10  }
   0xd   :  { %178 = dma.done.wait [#allocation3], 256  }
   0xe   :  { %179 = vsyncadd [#allocation3], 4294967040  ;;  %v25_v0 = vlaneseq  ;;  %s185_s13 = smov 1   ;;  %v24_v2 = vld [vmem:[#allocation2 + $0x8] sm:$0xff]  ;;  %v23_v3 = vld [vmem:[#allocation2] sm:$0xff]  ;;  %s186_s14 = smov 127  }
   0xf   :  { %29 = vrot.lane.b32.xlu1 %v24_v2, %s185_s13  ;;  %s187_s15 = smov 2   ;;  %v188_v8 = vmov 0   ;;  %s189_s0 = smov 126  }
  0x10   :  { %v210_v1 = vand.u32 127, %v25_v0  ;;  %v41_v4 = vshrl.u32 %v25_v0, 7  ;;  %s190_s16 = smov 4   ;;  %s191_s17 = smov 124  }
  0x11   :  { %s192_s18 = smov 120   ;;  %s193_s19 = smov [#allocation5]  }
  0x12   :  { %35 = vrot.lane.b32.xlu0 %v210_v1, %s185_s13  ;;  %v37_v5 = vxor.u32 1, %v210_v1  ;;  %v215_v6 = vsub.s32 0, %v41_v4  ;;  %v57_v17 = vxor.u32 2, %v210_v1  ;;  %v77_v27 = vxor.u32 4, %v210_v1  ;;  %s114_s20 = sshll.u32 %s193_s19, 4  ;;  %s115_s20 = int_to_ptr.vmem [resolvable:$true] %s114_s20 }
  0x13   :  { %31 = vrot.lane.b32.xlu1 %v23_v3, %s186_s14  ;;  %v97_v37 = vxor.u32 8, %v210_v1  ;;  %s158_s21 = scalar_lea.vmem %s115_s20, 256  ;;  %p163_p6 = scmp.lt.s32.totalorder %s115_s20, %s115_s20 }
  0x14   :  { %p159_p5 = scmp.ne.s32.totalorder %s115_s20, %s158_s21  ;;  %p164_p7 = scmp.lt.s32.totalorder %s158_s21, %s158_s21 }
  0x16   :  { %27 = vrot.lane.b32.xlu0 %v23_v3, %s185_s13  ;;  %p165_p8 = por %p164_p7, %p163_p6 }
  0x17   :  { %55 = vrot.lane.b32.xlu1 %v210_v1, %s187_s15 }
  0x18   :  { %p166_p9 = pnand %p165_p8, %p159_p5 }
  0x1a   :  { %33 = vrot.lane.b32.xlu0 %v24_v2, %s186_s14 }
  0x81   :  { %v30_v11 = vpop.permute.xlu1 %29 }
  0x84   :  { %v36_v7 = vpop.permute.xlu0 %35 }
  0x85   :  { %vm38_vm0 = vcmp.eq.s32.totalorder %v36_v7, %v37_v5  ;;  %v32_v13 = vpop.permute.xlu1 %31 }
  0x86   :  { %v39_v9 = vsel %vm38_vm0, 1, %v188_v8 }
  0x87   :  { %v43_v10 = vrot.slane %v39_v9, %v215_v6 }
  0x88   :  { %v28_v12 = vpop.permute.xlu0 %27 }
  0x89   :  { %vm44_vm1 = vcmp.eq.s32.totalorder %v43_v10, 1  ;;  %v56_v18 = vpop.permute.xlu1 %55 }
  0x8a   :  { %v45_v15 = vsel %vm44_vm1, %v28_v12, %v32_v13  ;;  %vm58_vm2 = vcmp.eq.s32.totalorder %v56_v18, %v57_v17 }
  0x8b   :  { %47 = vrot.lane.b32.xlu0 %v45_v15, %s187_s15  ;;  %v59_v19 = vsel %vm58_vm2, 1, %v188_v8 }
  0x8c   :  { %v34_v14 = vpop.permute.xlu0 %33  ;;  %v63_v20 = vrot.slane %v59_v19, %v215_v6 }
  0x8d   :  { %v46_v16 = vsel %vm44_vm1, %v30_v11, %v34_v14 }
  0x8e   :  { %49 = vrot.lane.b32.xlu1 %v46_v16, %s187_s15  ;;  %vm64_vm3 = vcmp.eq.s32.totalorder %v63_v20, 1 }
  0x8f   :  { %51 = vrot.lane.b32.xlu0 %v45_v15, %s189_s0 }
  0x92   :  { %53 = vrot.lane.b32.xlu1 %v46_v16, %s189_s0 }
  0x93   :  { %75 = vrot.lane.b32.xlu0 %v210_v1, %s190_s16 }
  0xfd   :  { %v48_v22 = vpop.permute.xlu0 %47 }
 0x100   :  { %v50_v21 = vpop.permute.xlu1 %49 }
 0x101   :  { %v52_v24 = vpop.permute.xlu0 %51 }
 0x102   :  { %v65_v26 = vsel %vm64_vm3, %v48_v22, %v52_v24 }
 0x103   :  { %67 = vrot.lane.b32.xlu1 %v65_v26, %s190_s16 }
 0x104   :  { %v54_v23 = vpop.permute.xlu1 %53 }
 0x105   :  { %v66_v25 = vsel %vm64_vm3, %v50_v21, %v54_v23  ;;  %v76_v28 = vpop.permute.xlu0 %75 }
 0x106   :  { %69 = vrot.lane.b32.xlu0 %v66_v25, %s190_s16  ;;  %vm78_vm4 = vcmp.eq.s32.totalorder %v76_v28, %v77_v27 }
 0x107   :  { %71 = vrot.lane.b32.xlu1 %v65_v26, %s191_s17  ;;  %v79_v29 = vsel %vm78_vm4, 1, %v188_v8 }
 0x108   :  { %v83_v30 = vrot.slane %v79_v29, %v215_v6 }
 0x10a   :  { %73 = vrot.lane.b32.xlu0 %v66_v25, %s191_s17  ;;  %vm84_vm5 = vcmp.eq.s32.totalorder %v83_v30, 1 }
 0x10b   :  { %95 = vrot.lane.b32.xlu1 %v210_v1, %s184_s10 }
 0x175   :  { %v68_v31 = vpop.permute.xlu1 %67 }
 0x178   :  { %v70_v32 = vpop.permute.xlu0 %69 }
 0x179   :  { %v72_v33 = vpop.permute.xlu1 %71 }
 0x17a   :  { %v85_v35 = vsel %vm84_vm5, %v68_v31, %v72_v33 }
 0x17b   :  { %87 = vrot.lane.b32.xlu0 %v85_v35, %s184_s10 }
 0x17c   :  { %v74_v34 = vpop.permute.xlu0 %73 }
 0x17d   :  { %v86_v36 = vsel %vm84_vm5, %v70_v32, %v74_v34  ;;  %v96_v38 = vpop.permute.xlu1 %95 }
 0x17e   :  { %89 = vrot.lane.b32.xlu1 %v86_v36, %s184_s10  ;;  %vm98_vm6 = vcmp.eq.s32.totalorder %v96_v38, %v97_v37 }
 0x17f   :  { %91 = vrot.lane.b32.xlu0 %v85_v35, %s192_s18  ;;  %v99_v39 = vsel %vm98_vm6, 1, %v188_v8 }
 0x180   :  { %v103_v40 = vrot.slane %v99_v39, %v215_v6 }
 0x182   :  { %93 = vrot.lane.b32.xlu1 %v86_v36, %s192_s18  ;;  %vm104_vm7 = vcmp.eq.s32.totalorder %v103_v40, 1 }
 0x1ed   :  { %v88_v42 = vpop.permute.xlu0 %87 }
 0x1f0   :  { %v90_v41 = vpop.permute.xlu1 %89 }
 0x1f1   :  { %v92_v44 = vpop.permute.xlu0 %91 }
 0x1f2   :  { %v105_v46 = vsel %vm104_vm7, %v88_v42, %v92_v44 }
 0x1f3   :  { %107 = vst [vmem:[#allocation5] sm:$0xff] %v105_v46 }
 0x1f4   :  { %v94_v43 = vpop.permute.xlu1 %93 }
 0x1f5   :  { %v106_v45 = vsel %vm104_vm7, %v90_v41, %v94_v43 }
 0x1f6   :  { %108 = vst [vmem:[#allocation5 + $0x8] sm:$0xff] %v106_v45 }
 0x1f7   :  { %169 = shalt.err (!%p166_p9)
}
 0x1f8   :  { %120 = dma.vmem_to_hbm [thread:$0]  %s115_s20, 256, %s236_s1, [#allocation4], %s183_s9, %s183_s9, %s184_s10  }
 0x1f9   :  { %180 = dma.done.wait [#allocation4], 256  }
 0x1fa   :  { %181 = vsyncadd [#allocation4], 4294967040 }
 0x1fb   :  { %124 = vsyncpa [#allocation3], 1 }
 0x1fc   :  { %125 = vsyncpa [#allocation4], 1 }

</bundles_post_ra>
